<compile_context>
chip_gen: v5e
topology: v5e:2x2
jax: 0.10.0
libtpu: 0.0.40
codegen_flags: <defaults>
</compile_context>

<pallas_src>
import math

import jax
import jax.numpy as jnp
from jax import lax
from jax.experimental import pallas as pl
from jax.experimental.pallas import tpu as pltpu


# ----------------------------------------------------------------------------
# VMEM budget: generation-aware (v7x has 64 MiB/TC vs 128 MiB on v5e/v6e).
# ----------------------------------------------------------------------------
def _default_vmem_limit():
    try:
        cap = int(pltpu.get_tpu_info().vmem_capacity_bytes)
    except Exception:
        cap = 128 * 1024 * 1024
    return max(32 * 1024 * 1024, min(cap // 2, 64 * 1024 * 1024))


_VMEM_LIMIT = _default_vmem_limit()


# ----------------------------------------------------------------------------
# Tiled linear kernel:  y = x @ W^T + b
# (W pre-transposed + pre-cast to bf16 once at init; x cast to bf16 in-kernel;
#  accumulation in f32 on the MXU; output dtype selectable so Q/K/V/ctx stay
#  bf16 end-to-end while the final projection emits f32.)
# ----------------------------------------------------------------------------
def _linear_kernel(x_ref, w_ref, b_ref, o_ref, acc_ref):
    @pl.when(pl.program_id(2) == 0)
    def _():
        acc_ref[...] = jnp.zeros_like(acc_ref)

    acc_ref[...] += jnp.dot(
        x_ref[...].astype(jnp.bfloat16),   # bf16 operands, f32 accumulation
        w_ref[...],
        preferred_element_type=jnp.float32,
    )

    @pl.when(pl.program_id(2) == pl.num_programs(2) - 1)
    def _():
        o_ref[...] = (acc_ref[...] + b_ref[...]).astype(o_ref.dtype)


def _pick_tile(dim):
    """MXU/lane friendly tile. Small dims -> one full block; large non-divisible
    dims -> tile at 128 and let the caller zero-pad (no huge fallback block)."""
    for c in (512, 256, 128):
        if dim % c == 0:
            return c
    if dim <= 128:
        return dim
    return 128


def _linear(x2d, w_t_bf16, b_row, out_dtype):
    """y = x2d @ w_t + b.  x2d:(M,K) f32|bf16, w_t:(K,N) bf16, b:(1,N) f32."""
    M, K = x2d.shape
    N = w_t_bf16.shape[1]
    tm, tn, tk = _pick_tile(M), _pick_tile(N), _pick_tile(K)
    Mp, Np, Kp = M + (-M) % tm, N + (-N) % tn, K + (-K) % tk
    if (Mp, Kp) != (M, K):
        x2d = jnp.pad(x2d, ((0, Mp - M), (0, Kp - K)))
    if (Kp, Np) != (K, N):
        w_t_bf16 = jnp.pad(w_t_bf16, ((0, Kp - K), (0, Np - N)))
    if Np != N:
        b_row = jnp.pad(b_row, ((0, 0), (0, Np - N)))

    out = pl.pallas_call(
        _linear_kernel,
        out_shape=jax.ShapeDtypeStruct((Mp, Np), out_dtype),
        grid_spec=pltpu.PrefetchScalarGridSpec(
            num_scalar_prefetch=0,
            grid=(Mp // tm, Np // tn, Kp // tk),
            in_specs=[
                pl.BlockSpec((tm, tk), lambda i, j, k: (i, k)),
                pl.BlockSpec((tk, tn), lambda i, j, k: (k, j)),
                pl.BlockSpec((1, tn), lambda i, j, k: (0, j)),
            ],
            out_specs=pl.BlockSpec((tm, tn), lambda i, j, k: (i, j)),
            scratch_shapes=[pltpu.VMEM((tm, tn), jnp.float32)],
        ),
        compiler_params=pltpu.CompilerParams(
            dimension_semantics=("parallel", "parallel", "arbitrary"),
            vmem_limit_bytes=_VMEM_LIMIT,
        ),
    )(x2d, w_t_bf16, b_row)
    if (Mp, Np) != (M, N):
        out = out[:M, :N]
    return out


# ----------------------------------------------------------------------------
# Attention kernel: one (batch, head, q-tile) block per grid step.
# ----------------------------------------------------------------------------
def _pick_q_tile(sq):
    for c in (512, 256, 128):
        if sq % c == 0:
            return c
    # TODO(synk): pad Sq for large non-128-divisible query lengths.
    return sq


def _make_attn_kernel(inv_scale, with_mask):
    def _body(q_ref, k_ref, v_ref, mask_ref, attn_ref, ctx_ref):
        q = q_ref[0, 0]                      # (tq, D)  bf16
        k = k_ref[0, 0]                      # (Sk, D)  bf16
        v = v_ref[0, 0]                      # (Sk, D)  bf16
        # QK^T: contract over head_dim directly (no k transpose materialized).
        energy = lax.dot_general(
            q, k, (((1,), (1,)), ((), ())),
            preferred_element_type=jnp.float32) * inv_scale
        if mask_ref is not None:
            energy = jnp.where(mask_ref[0, 0] == 0.0, -1e9, energy)
        # Exact f32 softmax (the attention matrix is returned; rows sum to 1).
        m = jnp.max(energy, axis=-1, keepdims=True)
        e = jnp.exp(energy - m)
        s = jnp.sum(e, axis=-1, keepdims=True)
        p = e / s
        attn_ref[0, 0] = p.astype(attn_ref.dtype)
        # TODO(synk): dropout on attention probs is identity (inference mode).
        ctx_ref[0, 0] = lax.dot_general(
            p.astype(jnp.bfloat16), v, (((1,), (0,)), ((), ())),
            preferred_element_type=jnp.float32).astype(ctx_ref.dtype)
        # TODO(synk): for very long Sk, stream K/V tiles with an online softmax;
        # the module must return the full (Sq, Sk) attention matrix, so per
        # (b, h, q-tile) blocks are used here instead.

    if with_mask:
        def kernel(q_ref, k_ref, v_ref, mask_ref, attn_ref, ctx_ref):
            _body(q_ref, k_ref, v_ref, mask_ref, attn_ref, ctx_ref)
    else:
        def kernel(q_ref, k_ref, v_ref, attn_ref, ctx_ref):
            _body(q_ref, k_ref, v_ref, None, attn_ref, ctx_ref)
    return kernel


def _attention(Qh, Kh, Vh, inv_scale, mask=None):
    """Qh:(B,H,Sq,D) bf16, Kh/Vh:(B,H,Sk,D) bf16, mask:(B,H,Sq,Sk) f32 or None."""
    B, H, Sq, D = Qh.shape
    Sk = Kh.shape[2]
    tq = _pick_q_tile(Sq)

    in_specs = [
        pl.BlockSpec((1, 1, tq, D), lambda b, h, qi: (b, h, qi, 0)),
        pl.BlockSpec((1, 1, Sk, D), lambda b, h, qi: (b, h, 0, 0)),
        pl.BlockSpec((1, 1, Sk, D), lambda b, h, qi: (b, h, 0, 0)),
    ]
    args = [Qh, Kh, Vh]
    if mask is not None:
        in_specs.append(pl.BlockSpec((1, 1, tq, Sk), lambda b, h, qi: (b, h, qi, 0)))
        args.append(mask)

    return pl.pallas_call(
        _make_attn_kernel(inv_scale, mask is not None),
        out_shape=(
            jax.ShapeDtypeStruct((B, H, Sq, Sk), jnp.float32),   # attention probs
            jax.ShapeDtypeStruct((B, H, Sq, D), jnp.bfloat16),   # per-head context
        ),
        grid_spec=pltpu.PrefetchScalarGridSpec(
            num_scalar_prefetch=0,
            grid=(B, H, Sq // tq),
            in_specs=in_specs,
            out_specs=(
                pl.BlockSpec((1, 1, tq, Sk), lambda b, h, qi: (b, h, qi, 0)),
                pl.BlockSpec((1, 1, tq, D), lambda b, h, qi: (b, h, qi, 0)),
            ),
        ),
        compiler_params=pltpu.CompilerParams(
            # batch AND head axes parallel -> shardable across v7x's 2 TensorCores.
            dimension_semantics=("parallel", "parallel", "parallel"),
            vmem_limit_bytes=_VMEM_LIMIT,
        ),
    )(*args)


# ----------------------------------------------------------------------------
# Module wrapper
# ----------------------------------------------------------------------------
class MultiHeadAttentionLayerPallas:
    def __init__(self, hid_dim, n_head, dropout, key):
        assert hid_dim % n_head == 0
        self.hid_dim = hid_dim
        self.n_head = n_head
        self.head_dim = hid_dim // n_head
        self.scale = math.sqrt(self.head_dim)
        self.inv_scale = 1.0 / self.scale
        self.dropout = dropout  # TODO(synk): dropout is identity (eval mode).

        ks = jax.random.split(key, 8)
        bound = 1.0 / math.sqrt(hid_dim)

        def init_linear(kw, kb):
            w = jax.random.uniform(kw, (hid_dim, hid_dim), jnp.float32, -bound, bound)
            b = jax.random.uniform(kb, (hid_dim,), jnp.float32, -bound, bound)
            return w, b

        wq, bq = init_linear(ks[0], ks[1])
        wk, bk = init_linear(ks[2], ks[3])
        wv, bv = init_linear(ks[4], ks[5])
        wo, bo = init_linear(ks[6], ks[7])

        # Pre-transpose once (y = x @ W^T + b) and pre-cast weights to bf16;
        # biases kept in f32, shaped (1, N) for the kernel bias block.
        self.wq_t = wq.T.astype(jnp.bfloat16)
        self.wk_t = wk.T.astype(jnp.bfloat16)
        self.wv_t = wv.T.astype(jnp.bfloat16)
        self.wo_t = wo.T.astype(jnp.bfloat16)
        self.bq = bq[None, :]
        self.bk = bk[None, :]
        self.bv = bv[None, :]
        self.bo = bo[None, :]

    def __call__(self, query, key, value, mask=None):
        B, Sq, Hd = query.shape
        Sk = key.shape[1]
        H, D = self.n_head, self.head_dim

        # Projections emit bf16 activations (f32 accumulation inside the kernel).
        q2 = _linear(query.reshape(B * Sq, Hd), self.wq_t, self.bq, jnp.bfloat16)
        k2 = _linear(key.reshape(B * Sk, Hd), self.wk_t, self.bk, jnp.bfloat16)
        v2 = _linear(value.reshape(B * Sk, Hd), self.wv_t, self.bv, jnp.bfloat16)

        # Head split as layout plumbing outside the kernel -> tile-aligned
        # (S, head_dim) blocks inside, addressed purely via BlockSpec.
        Qh = jnp.transpose(q2.reshape(B, Sq, H, D), (0, 2, 1, 3))
        Kh = jnp.transpose(k2.reshape(B, Sk, H, D), (0, 2, 1, 3))
        Vh = jnp.transpose(v2.reshape(B, Sk, H, D), (0, 2, 1, 3))

        mask_full = None
        if mask is not None:
            mask_full = jnp.broadcast_to(mask, (B, H, Sq, Sk)).astype(jnp.float32)

        attention, ctx = _attention(Qh, Kh, Vh, self.inv_scale, mask_full)

        # Merge heads (bf16, cheap) and run the output projection in f32.
        ctx2 = jnp.transpose(ctx, (0, 2, 1, 3)).reshape(B * Sq, Hd)
        out = _linear(ctx2, self.wo_t, self.bo, jnp.float32).reshape(B, Sq, Hd)
        return out, attention


# ----------------------------------------------------------------------------
# Pure-JAX f32 reference (same bf16 weights, exact softmax) for validation
# ----------------------------------------------------------------------------
def _reference_forward(layer, query, key, value, mask=None):
    def lin(x, w_t, b_row):
        return x.astype(jnp.float32) @ w_t.astype(jnp.float32) + b_row[0]

    B, Sq, Hd = query.shape
    Sk = key.shape[1]
    H, D = layer.n_head, layer.head_dim
    Q = lin(query, layer.wq_t, layer.bq).reshape(B, Sq, H, D).transpose(0, 2, 1, 3)
    K = lin(key, layer.wk_t, layer.bk).reshape(B, Sk, H, D).transpose(0, 2, 1, 3)
    V = lin(value, layer.wv_t, layer.bv).reshape(B, Sk, H, D).transpose(0, 2, 1, 3)
    energy = jnp.einsum("bhqd,bhkd->bhqk", Q, K) / layer.scale
    if mask is not None:
        energy = jnp.where(jnp.broadcast_to(mask, energy.shape) == 0, -1e9, energy)
    attn = jax.nn.softmax(energy, axis=-1)
    ctx = jnp.einsum("bhqk,bhkd->bhqd", attn, V).transpose(0, 2, 1, 3).reshape(B, Sq, Hd)
    out = lin(ctx, layer.wo_t, layer.bo)
    return out, attn


# ----------------------------------------------------------------------------
# Demo
# ----------------------------------------------------------------------------
if __name__ == "__main__":
    B, S, HID, NHEAD = 2, 8, 32, 4
    root = jax.random.PRNGKey(0)
    kparam, kx, kq, kk, kv = jax.random.split(root, 5)

    layer = MultiHeadAttentionLayerPallas(HID, NHEAD, dropout=0.1, key=kparam)

    # --- self-attention ---
    x = jax.random.normal(kx, (B, S, HID), jnp.float32)
    out_sa, attn_sa = layer(x, x, x)
    jax.block_until_ready(out_sa)
    jax.block_until_ready(attn_sa)
    assert out_sa.shape == (B, S, HID)
    assert attn_sa.shape == (B, NHEAD, S, S)
    assert bool(jnp.allclose(jnp.sum(attn_sa, axis=-1), 1.0, atol=2e-3))
    r_out, r_attn = _reference_forward(layer, x, x, x)
    assert bool(jnp.allclose(out_sa, r_out, atol=5e-2, rtol=5e-2))
    assert bool(jnp.allclose(attn_sa, r_attn, atol=5e-2, rtol=5e-2))

    # --- cross-attention (different key/value length) ---
    SKV = 16
    q_in = jax.random.normal(kq, (B, S, HID), jnp.float32)
    k_in = jax.random.normal(kk, (B, SKV, HID), jnp.float32)
    v_in = jax.random.normal(kv, (B, SKV, HID), jnp.float32)
    out_ca, attn_ca = layer(q_in, k_in, v_in)
    jax.block_until_ready(out_ca)
    jax.block_until_ready(attn_ca)
    assert out_ca.shape == (B, S, HID)
    assert attn_ca.shape == (B, NHEAD, S, SKV)
    assert bool(jnp.allclose(jnp.sum(attn_ca, axis=-1), 1.0, atol=2e-3))
    r_out, r_attn = _reference_forward(layer, q_in, k_in, v_in)
    assert bool(jnp.allclose(out_ca, r_out, atol=5e-2, rtol=5e-2))
    assert bool(jnp.allclose(attn_ca, r_attn, atol=5e-2, rtol=5e-2))

    # --- masked self-attention (causal mask, matches PyTorch masked_fill path) ---
    mask = jnp.tril(jnp.ones((S, S), jnp.int32))[None, None]   # (1, 1, S, S)
    out_m, attn_m = layer(x, x, x, mask=mask)
    jax.block_until_ready(out_m)
    jax.block_until_ready(attn_m)
    r_out_m, r_attn_m = _reference_forward(layer, x, x, x, mask=mask)
    assert bool(jnp.allclose(jnp.sum(attn_m, axis=-1), 1.0, atol=2e-3))
    assert float(jnp.max(jnp.where(jnp.broadcast_to(mask, attn_m.shape) == 0,
                                   attn_m, 0.0))) < 1e-6
    assert bool(jnp.allclose(out_m, r_out_m, atol=5e-2, rtol=5e-2))
    assert bool(jnp.allclose(attn_m, r_attn_m, atol=5e-2, rtol=5e-2))

    print("KERNEL_OK")
</pallas_src>

<mosaic_0001>
module attributes {stable_mosaic.version = 11 : i64} {
  func.func @_linear_kernel(%arg0: i32, %arg1: i32, %arg2: i32, %arg3: memref<16x32xf32, #tpu.memory_space<vmem>>, %arg4: memref<32x32xbf16, #tpu.memory_space<vmem>>, %arg5: memref<1x32xf32, #tpu.memory_space<vmem>>, %arg6: memref<16x32xbf16, #tpu.memory_space<vmem>>, %arg7: memref<16x32xf32, #tpu.memory_space<vmem>>) attributes {dimension_semantics = [#tpu.dimension_semantics<parallel>, #tpu.dimension_semantics<parallel>, #tpu.dimension_semantics<arbitrary>], iteration_bounds = array<i64: 1, 1, 1>, scalar_prefetch = 0 : i64, scratch_operands = 1 : i64, tpu.core_type = #tpu.core_type<tc>, window_params = [{transform_indices = @transform_0, window_bounds = array<i64: 16, 32>}, {transform_indices = @transform_1, window_bounds = array<i64: 32, 32>}, {transform_indices = @transform_2, window_bounds = array<i64: 1, 32>}, {transform_indices = @transform_3, window_bounds = array<i64: 16, 32>}]} {
    %c0_i32 = arith.constant 0 : i32
    %0 = arith.cmpi eq, %arg2, %c0_i32 : i32
    %1 = arith.extui %0 : i1 to i32
    %c0_i32_0 = arith.constant 0 : i32
    %2 = arith.cmpi ne, %1, %c0_i32_0 : i32
    scf.if %2 {
      %cst_10 = arith.constant 0.000000e+00 : f32
      %13 = vector.broadcast %cst_10 : f32 to vector<16x32xf32>
      %c0_11 = arith.constant 0 : index
      %c0_12 = arith.constant 0 : index
      %14 = vector.load %arg7[%c0_11, %c0_12] : memref<16x32xf32, #tpu.memory_space<vmem>>, vector<16x32xf32>
      tpu.vector_store %arg7[%c0_11, %c0_12], %13 {strides = array<i32>} : memref<16x32xf32, #tpu.memory_space<vmem>>, vector<16x32xf32>,
    } else {
    }
    %c0 = arith.constant 0 : index
    %c0_1 = arith.constant 0 : index
    %3 = vector.load %arg7[%c0, %c0_1] : memref<16x32xf32, #tpu.memory_space<vmem>>, vector<16x32xf32>
    %c0_2 = arith.constant 0 : index
    %c0_3 = arith.constant 0 : index
    %4 = vector.load %arg3[%c0_2, %c0_3] : memref<16x32xf32, #tpu.memory_space<vmem>>, vector<16x32xf32>
    %5 = arith.truncf %4 : vector<16x32xf32> to vector<16x32xbf16>
    %c0_4 = arith.constant 0 : index
    %c0_5 = arith.constant 0 : index
    %6 = vector.load %arg4[%c0_4, %c0_5] : memref<32x32xbf16, #tpu.memory_space<vmem>>, vector<32x32xbf16>
    %cst = arith.constant dense<0.000000e+00> : vector<16x32xf32>
    %7 = tpu.matmul %5, %6, %cst {dimension_numbers = #tpu.dot_dimension_numbers<[1], [0], [0], [1], [0, 0, 1, 1], [], []>} : vector<16x32xbf16>, vector<32x32xbf16>, vector<16x32xf32> -> vector<16x32xf32>
    %8 = arith.addf %3, %7 : vector<16x32xf32>
    %c0_6 = arith.constant 0 : index
    %c0_7 = arith.constant 0 : index
    %9 = vector.load %arg7[%c0_6, %c0_7] : memref<16x32xf32, #tpu.memory_space<vmem>>, vector<16x32xf32>
    tpu.vector_store %arg7[%c0_6, %c0_7], %8 {strides = array<i32>} : memref<16x32xf32, #tpu.memory_space<vmem>>, vector<16x32xf32>,
    %c0_i32_8 = arith.constant 0 : i32
    %10 = arith.cmpi eq, %arg2, %c0_i32_8 : i32
    %11 = arith.extui %10 : i1 to i32
    %c0_i32_9 = arith.constant 0 : i32
    %12 = arith.cmpi ne, %11, %c0_i32_9 : i32
    scf.if %12 {
      %c0_10 = arith.constant 0 : index
      %c0_11 = arith.constant 0 : index
      %13 = vector.load %arg7[%c0_10, %c0_11] : memref<16x32xf32, #tpu.memory_space<vmem>>, vector<16x32xf32>
      %c0_12 = arith.constant 0 : index
      %c0_13 = arith.constant 0 : index
      %14 = vector.load %arg5[%c0_12, %c0_13] : memref<1x32xf32, #tpu.memory_space<vmem>>, vector<1x32xf32>
      %15 = vector.broadcast %14 : vector<1x32xf32> to vector<16x32xf32>
      %16 = arith.addf %13, %15 : vector<16x32xf32>
      %17 = arith.truncf %16 : vector<16x32xf32> to vector<16x32xbf16>
      %c0_14 = arith.constant 0 : index
      %c0_15 = arith.constant 0 : index
      %18 = vector.load %arg6[%c0_14, %c0_15] : memref<16x32xbf16, #tpu.memory_space<vmem>>, vector<16x32xbf16>
      tpu.vector_store %arg6[%c0_14, %c0_15], %17 {strides = array<i32>} : memref<16x32xbf16, #tpu.memory_space<vmem>>, vector<16x32xbf16>,
    } else {
    }
    return
  }
  func.func @transform_0(%arg0: i32, %arg1: i32, %arg2: i32) -> (i32, i32) {
    %c0_i32 = arith.constant 0 : i32
    return %arg0, %arg2 : i32, i32
  }
  func.func @transform_1(%arg0: i32, %arg1: i32, %arg2: i32) -> (i32, i32) {
    %c0_i32 = arith.constant 0 : i32
    return %arg2, %arg1 : i32, i32
  }
  func.func @transform_2(%arg0: i32, %arg1: i32, %arg2: i32) -> (i32, i32) {
    %c0_i32 = arith.constant 0 : i32
    %c0_i32_0 = arith.constant 0 : i32
    return %c0_i32, %arg1 : i32, i32
  }
  func.func @transform_3(%arg0: i32, %arg1: i32, %arg2: i32) -> (i32, i32) {
    %c0_i32 = arith.constant 0 : i32
    return %arg0, %arg1 : i32, i32
  }
}

</mosaic_0001>

<bundles_post_ra>
// kernel: tpu_custom_call.1
= control target key start
LH: loop header
LB: loop body
LE: loop exit
PB: predicated region body
PF: predicated region fallthrough
CT: control target
= control target key end

     0   :  { %8 = vsyncpa [#allocation4], 0  ;;  %s283_s0 = inlined_call_operand.hbm [shape: f32[16,32], index: 0, kind: input, shape index: {}]   ;;  %s284_s1 = inlined_call_operand.hbm [shape: bf16[32,32], index: 1, kind: input, shape index: {}]   ;;  %s285_s2 = inlined_call_operand.vmem [shape: f32[1,32], index: 2, kind: input, shape index: {}]   ;;  %s286_s3 = inlined_call_operand.hbm [shape: bf16[16,32], index: 3, kind: output, shape index: {}]  }
   0x1   :  { %9 = vsyncpa [#allocation7], 0 }
   0x2   :  { %10 = vsyncpa [#allocation5], 0  ;;  %s15_s14 = sshll.u32 %s283_s0, 4  ;;  %s232_s15 = smov [#allocation3]   ;;  %s16_s14 = int_to_ptr.hbm [resolvable:$true] %s15_s14 }
   0x3   :  { %s17_s16 = sshll.u32 %s232_s15, 4  ;;  %s28_s19 = sshll.u32 %s284_s1, 4  ;;  %s18_s16 = int_to_ptr.vmem [resolvable:$true] %s17_s16  ;;  %s29_s19 = int_to_ptr.hbm [resolvable:$true] %s28_s19 }
   0x4   :  { %s233_s20 = smov 128   ;;  %s234_s21 = smov 8  }
   0x5   :  { %23 = dma.hbm_to_vmem [thread:$0]  %s16_s14, 256, %s18_s16, [#allocation4], %s233_s20, %s233_s20, %s234_s21  }
   0x6   :  { %s235_s22 = smov [#allocation6]   ;;  %s236_s24 = smov 64  }
   0x7   :  { %s30_s23 = sshll.u32 %s235_s22, 4  ;;  %s237_s25 = smov 4   ;;  %s31_s23 = int_to_ptr.vmem [resolvable:$true] %s30_s23 }
   0x8   :  { %36 = dma.hbm_to_vmem [thread:$0]  %s29_s19, 256, %s31_s23, [#allocation7], %s236_s24, %s236_s24, %s237_s25  }
   0x9   :  { %226 = dma.done.wait [#allocation4], 256  }
   0xa   :  { %227 = vsyncadd [#allocation4], 4294967040 }
   0xb   :  { %228 = dma.done.wait [#allocation7], 256  }
   0xc   :  { %229 = vsyncadd [#allocation7], 4294967040  ;;  %vm52_vm0 = vcmask 261120   ;;  %v238_v0 = vmov 0.0   ;;  %v144_v1 = vld [vmem:[#allocation6 + $0x8] sm:$0xff]  ;;  %v143_v2 = vld [vmem:[#allocation6] sm:$0xff] }
   0xd   :  { %53 = vst.msk [vmem:[#allocation2] sm:$0xff] %vm52_vm0, %v238_v0  ;;  %86 = vmatpush.bf16.msra.mxu0 %v144_v1  ;;  %v57_v3 = vld [vmem:[#allocation3] sm:$0xff]  ;;  %v58_v4 = vld [vmem:[#allocation3 + $0x8] sm:$0xff]  ;;  %v153_v10 = vld [vmem:[%s285_s2] ss:$0 sm:$0xff]  ;;  %vm111_vm1 = vcmask 257024  }
   0xe   :  { %54 = vst.msk [vmem:[#allocation2 + $0x8] sm:$0xff] %vm52_vm0, %v238_v0  ;;  %v59_v5 = vpack.c.bf16 %v58_v4, %v57_v3  ;;  %s239_s26 = smov [#allocation8]   ;;  %s120_s30 = sshll.u32 %s286_s3, 4  ;;  %s121_s30 = int_to_ptr.hbm [resolvable:$true] %s120_s30 }
   0xf   :  { %s118_s27 = sshll.u32 %s239_s26, 4  ;;  %s119_s27 = int_to_ptr.vmem [resolvable:$true] %s118_s27 }
  0x11   :  { %87 = vmatpush.bf16.msra.mxu0 %v143_v2 }
  0x14   :  { %142 = vmatmul.msk.bf16.vlgmr.msra.gmra.mxu0 %vm52_vm0, %v59_v5  ;;  %v55_v6 = vld [vmem:[#allocation2] sm:$0xff] }
  0x15   :  { %v56_v9 = vld [vmem:[#allocation2 + $0x8] sm:$0xff] }
  0x91   :  { %v89_v7 = vpop.f32.mrf.mxu0 }
  0x92   :  { %v94_v8 = vadd.f32 %v89_v7, %v55_v6 }
  0x94   :  { %96 = vst.msk [vmem:[#allocation2] sm:$0xff] %vm52_vm0, %v94_v8 }
  0x99   :  { %v91_v11 = vpop.f32.mrf.mxu0 }
  0x9a   :  { %v95_v12 = vadd.f32 %v91_v11, %v56_v9 }
  0x9b   :  { %v101_v13 = vld [vmem:[#allocation2] sm:$0xff] }
  0x9c   :  { %97 = vst.msk [vmem:[#allocation2 + $0x8] sm:$0xff] %vm52_vm0, %v95_v12  ;;  %v107_v14 = vadd.f32 %v153_v10, %v101_v13 }
  0x9e   :  { %v109_v15 = vpack.c.bf16 %v107_v14, %v107_v14 }
  0xa0   :  { %112 = vst.msk [vmem:[#allocation8] sm:$0xf] %vm111_vm1, %v109_v15 }
  0xa3   :  { %v102_v16 = vld [vmem:[#allocation2 + $0x8] sm:$0xff] }
  0xa4   :  { %v108_v17 = vadd.f32 %v153_v10, %v102_v16 }
  0xa6   :  { %v110_v18 = vpack.c.bf16 %v108_v17, %v108_v17 }
  0xa8   :  { %113 = vst.msk [vmem:[#allocation8 + $0x4] sm:$0xf] %vm111_vm1, %v110_v18 }
  0xa9   :  { %126 = dma.vmem_to_hbm [thread:$0]  %s119_s27, 128, %s121_s30, [#allocation5], %s236_s24, %s236_s24, %s237_s25  }
  0xaa   :  { %230 = dma.done.wait [#allocation5], 128  }
  0xab   :  { %231 = vsyncadd [#allocation5], 4294967168 }
  0xac   :  { %131 = vsyncpa [#allocation4], 1 }
  0xad   :  { %132 = vsyncpa [#allocation7], 1 }
  0xae   :  { %133 = vsyncpa [#allocation5], 1 }

</bundles_post_ra>
